<compile_context>
chip_gen: v7x
topology: tpu7x:2x2x1
jax: 0.10.0
libtpu: 0.0.40
codegen_flags: <defaults>
</compile_context>

<pallas_src>
import math

import jax
import jax.numpy as jnp
from jax.experimental import pallas as pl
from jax.experimental.pallas import tpu as pltpu


def conv_mlp_forward(x_nchw, w1_t, b1, w2_t, b2, w3_t, b3, gamma, beta,
                     *, eps=1e-5, matmul_dtype=jnp.float32):
    """Conv_MLP forward.

    x_nchw: (N, Cin, H, W) f32.  Weights in torch OIHW layout:
    w1_t (C,Cin,3,3), w2_t (C,C,1,1), w3_t (C,Cin,1,1); b1/b2/b3/gamma/beta (C,).
    Returns (N, C, H, W) f32.
    """
    N, Cin, H, W = x_nchw.shape
    C = w1_t.shape[0]
    Wp = W + 2                      # padded width
    M2 = (H + 2) * Wp               # padded pixels per image
    HE = H * Wp                     # "extended" output columns per image
    Mf = M2 + 2                     # flattened padded length (+1 guard each end)
    M_valid = N * H * W             # pixels contributing to BN statistics

    # ---------- wrapper-side layout prep (one ~1x copy, no 9x im2col) ----------
    xpad = jnp.pad(x_nchw, ((0, 0), (0, 0), (1, 1), (1, 1)))     # (N,Cin,H+2,W+2)
    xflat = xpad.reshape(N, Cin, M2)
    xflat = jnp.pad(xflat, ((0, 0), (0, 0), (1, 1)))             # (N,Cin,Mf)
    xflat = xflat.astype(matmul_dtype)

    # tap-major 3x3 weights: w1k[ky*3+kx] = w1_t[:, :, ky, kx]  -> (9, C, Cin)
    w1k = jnp.transpose(w1_t, (2, 3, 0, 1)).reshape(9, C, Cin).astype(matmul_dtype)
    w2k = w2_t[:, :, 0, 0].astype(matmul_dtype)                  # (C, C)
    w3k = w3_t[:, :, 0, 0].astype(matmul_dtype)                  # (C, Cin)

    # Extended column p maps to padded (row, col) = (p // Wp + 1, p % Wp).
    # Columns 0 and W+1 of each row are wrap-around garbage: masked out of the
    # statistics and sliced off the final output.
    col = jnp.arange(HE, dtype=jnp.int32) % Wp
    valid_mask = ((col >= 1) & (col <= W)).astype(jnp.float32).reshape(1, HE)

    # tap (ky, kx) of extended column p sits at flat index p + ky*Wp + kx
    tap_offsets = tuple(ky * Wp + kx for ky in range(3) for kx in range(3))
    center_off = tap_offsets[4]     # (ky, kx) == (1, 1): the original pixel

    def conv1_taps(x_ref, w1_ref):
        """3x3 conv (no bias) as 9 shifted matmuls; returns f32 (C, HE)."""
        acc = jnp.zeros((C, HE), jnp.float32)
        for t, off in enumerate(tap_offsets):
            xs = x_ref[0, :, pl.ds(off, HE)]                     # (Cin, HE)
            acc = acc + jnp.dot(w1_ref[t], xs,
                                preferred_element_type=jnp.float32)
        return acc

    # ---------- pass 1: per-channel sum / sum-of-squares of conv1(x) -----------
    def stats_kernel(x_ref, w1_ref, mask_ref, stats_ref):
        h = conv1_taps(x_ref, w1_ref)                            # (C, HE) f32
        m = mask_ref[...]                                        # (1, HE)
        hm = h * m
        s1 = jnp.sum(hm, axis=1, keepdims=True)                  # (C, 1)
        s2 = jnp.sum(hm * h, axis=1, keepdims=True)              # (C, 1)

        @pl.when(pl.program_id(0) == 0)
        def _():
            stats_ref[...] = jnp.zeros_like(stats_ref)

        stats_ref[...] += jnp.concatenate([s1, s2], axis=1)

    stats = pl.pallas_call(
        stats_kernel,
        out_shape=jax.ShapeDtypeStruct((C, 2), jnp.float32),
        grid=(N,),
        in_specs=[
            pl.BlockSpec((1, Cin, Mf), lambda n: (n, 0, 0)),
            pl.BlockSpec((9, C, Cin), lambda n: (0, 0, 0)),
            pl.BlockSpec((1, HE), lambda n: (0, 0)),
        ],
        out_specs=pl.BlockSpec((C, 2), lambda n: (0, 0)),
        compiler_params=pltpu.CompilerParams(
            dimension_semantics=("arbitrary",)),
    )(xflat, w1k, valid_mask)

    # ---------- fold BN (training mode, biased batch stats) into scale/shift ----
    # h_full = conv1(x) + b1; BN-train subtracts the batch mean, so b1 cancels.
    # (E[h^2]-E[h]^2 in f32 is well within the 1e-3 tolerance at these scales.)
    mean_h = stats[:, 0] / M_valid
    var_h = jnp.maximum(stats[:, 1] / M_valid - mean_h * mean_h, 0.0)
    scale = gamma * jax.lax.rsqrt(var_h + eps)
    shift = beta - mean_h * scale
    bias23 = b2 + b3                               # conv2 + conv3 biases pre-summed
    params = jnp.stack([scale, shift, bias23], axis=1).astype(jnp.float32)  # (C, 3)

    # ---------- pass 2: fused BN + GELU + 1x1 convs + residual ------------------
    inv_sqrt2 = 1.0 / math.sqrt(2.0)

    def main_kernel(x_ref, w1_ref, w2_ref, w3_ref, par_ref, out_ref):
        h = conv1_taps(x_ref, w1_ref)                            # (C, HE) f32
        scale_v = par_ref[:, 0:1]
        shift_v = par_ref[:, 1:2]
        bias_v = par_ref[:, 2:3]
        h = h * scale_v + shift_v                                # fused BatchNorm
        g = 0.5 * h * (1.0 + jax.lax.erf(h * inv_sqrt2))         # exact GELU
        xc = x_ref[0, :, pl.ds(center_off, HE)]                  # (Cin, HE) residual input
        out = (jnp.dot(w2_ref[...], g.astype(matmul_dtype),
                       preferred_element_type=jnp.float32)
               + jnp.dot(w3_ref[...], xc, preferred_element_type=jnp.float32)
               + bias_v)
        out_ref[0] = out.astype(out_ref.dtype)

    out_ext = pl.pallas_call(
        main_kernel,
        out_shape=jax.ShapeDtypeStruct((N, C, HE), jnp.float32),
        grid=(N,),
        in_specs=[
            pl.BlockSpec((1, Cin, Mf), lambda n: (n, 0, 0)),
            pl.BlockSpec((9, C, Cin), lambda n: (0, 0, 0)),
            pl.BlockSpec((C, C), lambda n: (0, 0)),
            pl.BlockSpec((C, Cin), lambda n: (0, 0)),
            pl.BlockSpec((C, 3), lambda n: (0, 0)),
        ],
        out_specs=pl.BlockSpec((1, C, HE), lambda n: (n, 0, 0)),
        compiler_params=pltpu.CompilerParams(
            dimension_semantics=("parallel",)),
    )(xflat, w1k, w2k, w3k, params)

    # strip the two wrap-around columns per row; result is already NCHW
    return out_ext.reshape(N, C, H, Wp)[:, :, :, 1:W + 1]


def _reference_forward(x, w1_t, b1, w2_t, b2, w3_t, b3, gamma, beta):
    """Pure-JAX reference with torch-layout (OIHW) weights, NCHW activations."""
    dn = ("NCHW", "OIHW", "NCHW")
    x_ori = jax.lax.conv_general_dilated(
        x, w3_t, (1, 1), "VALID", dimension_numbers=dn) + b3[None, :, None, None]
    h = jax.lax.conv_general_dilated(
        x, w1_t, (1, 1), ((1, 1), (1, 1)),
        dimension_numbers=dn) + b1[None, :, None, None]
    mean = jnp.mean(h, axis=(0, 2, 3), keepdims=True)
    var = jnp.mean((h - mean) ** 2, axis=(0, 2, 3), keepdims=True)
    h = (h - mean) * jax.lax.rsqrt(var + 1e-5) * gamma[None, :, None, None] \
        + beta[None, :, None, None]
    h = 0.5 * h * (1.0 + jax.lax.erf(h / jnp.sqrt(2.0)))
    h = jax.lax.conv_general_dilated(
        h, w2_t, (1, 1), "VALID", dimension_numbers=dn) + b2[None, :, None, None]
    return h + x_ori


if __name__ == "__main__":
    # small shapes consistent with the module
    N, Cin, H, W = 2, 4, 16, 16        # embed_dim_in = 4
    C = 8                               # embed_dim = 8

    key = jax.random.PRNGKey(0)
    ks = jax.random.split(key, 9)

    x = jax.random.normal(ks[0], (N, Cin, H, W), dtype=jnp.float32)

    # torch-layout parameters (deterministic synthetic init)
    w1_t = 0.1 * jax.random.normal(ks[1], (C, Cin, 3, 3), dtype=jnp.float32)
    b1 = 0.1 * jax.random.normal(ks[2], (C,), dtype=jnp.float32)
    w2_t = 0.1 * jax.random.normal(ks[3], (C, C, 1, 1), dtype=jnp.float32)
    b2 = 0.1 * jax.random.normal(ks[4], (C,), dtype=jnp.float32)
    w3_t = 0.1 * jax.random.normal(ks[5], (C, Cin, 1, 1), dtype=jnp.float32)
    b3 = 0.1 * jax.random.normal(ks[6], (C,), dtype=jnp.float32)
    gamma = 1.0 + 0.1 * jax.random.normal(ks[7], (C,), dtype=jnp.float32)
    beta = 0.1 * jax.random.normal(ks[8], (C,), dtype=jnp.float32)

    out = conv_mlp_forward(x, w1_t, b1, w2_t, b2, w3_t, b3, gamma, beta)
    out = jax.block_until_ready(out)

    ref = _reference_forward(x, w1_t, b1, w2_t, b2, w3_t, b3, gamma, beta)
    ref = jax.block_until_ready(ref)

    assert out.shape == (N, C, H, W)
    assert jnp.allclose(out, ref, atol=1e-3, rtol=1e-3), \
        f"max abs err {jnp.max(jnp.abs(out - ref))}"

    print("KERNEL_OK")
</pallas_src>

<mosaic_0001>
module attributes {stable_mosaic.version = 11 : i64} {
  func.func @stats_kernel(%arg0: i32, %arg1: memref<1x4x326xf32, #tpu.memory_space<vmem>>, %arg2: memref<9x8x4xf32, #tpu.memory_space<vmem>>, %arg3: memref<1x288xf32, #tpu.memory_space<vmem>>, %arg4: memref<8x2xf32, #tpu.memory_space<vmem>>) attributes {dimension_semantics = [#tpu.dimension_semantics<arbitrary>], iteration_bounds = array<i64: 2>, scalar_prefetch = 0 : i64, scratch_operands = 0 : i64, tpu.core_type = #tpu.core_type<tc>, window_params = [{transform_indices = @transform_0, window_bounds = array<i64: 1, 4, 326>}, {pipeline_mode = #tpu.pipeline_mode<synchronous>, transform_indices = @transform_1, window_bounds = array<i64: 9, 8, 4>}, {pipeline_mode = #tpu.pipeline_mode<synchronous>, transform_indices = @transform_2, window_bounds = array<i64: 1, 288>}, {pipeline_mode = #tpu.pipeline_mode<synchronous>, transform_indices = @transform_3, window_bounds = array<i64: 8, 2>}]} {
    %cst = arith.constant 0.000000e+00 : f32
    %0 = vector.broadcast %cst : f32 to vector<8x288xf32>
    %c0 = arith.constant 0 : index
    %c0_0 = arith.constant 0 : index
    %c0_1 = arith.constant 0 : index
    %1 = vector.load %arg1[%c0, %c0_0, %c0_1] : memref<1x4x326xf32, #tpu.memory_space<vmem>>, vector<1x4x288xf32>
    %2 = vector.shape_cast %1 : vector<1x4x288xf32> to vector<4x288xf32>
    %c0_2 = arith.constant 0 : index
    %c0_3 = arith.constant 0 : index
    %c0_4 = arith.constant 0 : index
    %3 = vector.load %arg2[%c0_2, %c0_3, %c0_4] : memref<9x8x4xf32, #tpu.memory_space<vmem>>, vector<1x8x4xf32>
    %4 = vector.shape_cast %3 : vector<1x8x4xf32> to vector<8x4xf32>
    %cst_5 = arith.constant dense<0.000000e+00> : vector<8x288xf32>
    %5 = tpu.matmul %4, %2, %cst_5 {dimension_numbers = #tpu.dot_dimension_numbers<[1], [0], [0], [1], [0, 0, 1, 1], [], []>} : vector<8x4xf32>, vector<4x288xf32>, vector<8x288xf32> -> vector<8x288xf32>
    %6 = arith.addf %0, %5 : vector<8x288xf32>
    %c0_6 = arith.constant 0 : index
    %c0_7 = arith.constant 0 : index
    %c1 = arith.constant 1 : index
    %7 = vector.load %arg1[%c0_6, %c0_7, %c1] : memref<1x4x326xf32, #tpu.memory_space<vmem>>, vector<1x4x288xf32>
    %8 = vector.shape_cast %7 : vector<1x4x288xf32> to vector<4x288xf32>
    %c1_8 = arith.constant 1 : index
    %c0_9 = arith.constant 0 : index
    %c0_10 = arith.constant 0 : index
    %9 = vector.load %arg2[%c1_8, %c0_9, %c0_10] : memref<9x8x4xf32, #tpu.memory_space<vmem>>, vector<1x8x4xf32>
    %10 = vector.shape_cast %9 : vector<1x8x4xf32> to vector<8x4xf32>
    %cst_11 = arith.constant dense<0.000000e+00> : vector<8x288xf32>
    %11 = tpu.matmul %10, %8, %cst_11 {dimension_numbers = #tpu.dot_dimension_numbers<[1], [0], [0], [1], [0, 0, 1, 1], [], []>} : vector<8x4xf32>, vector<4x288xf32>, vector<8x288xf32> -> vector<8x288xf32>
    %12 = arith.addf %6, %11 : vector<8x288xf32>
    %c0_12 = arith.constant 0 : index
    %c0_13 = arith.constant 0 : index
    %c2 = arith.constant 2 : index
    %13 = vector.load %arg1[%c0_12, %c0_13, %c2] : memref<1x4x326xf32, #tpu.memory_space<vmem>>, vector<1x4x288xf32>
    %14 = vector.shape_cast %13 : vector<1x4x288xf32> to vector<4x288xf32>
    %c2_14 = arith.constant 2 : index
    %c0_15 = arith.constant 0 : index
    %c0_16 = arith.constant 0 : index
    %15 = vector.load %arg2[%c2_14, %c0_15, %c0_16] : memref<9x8x4xf32, #tpu.memory_space<vmem>>, vector<1x8x4xf32>
    %16 = vector.shape_cast %15 : vector<1x8x4xf32> to vector<8x4xf32>
    %cst_17 = arith.constant dense<0.000000e+00> : vector<8x288xf32>
    %17 = tpu.matmul %16, %14, %cst_17 {dimension_numbers = #tpu.dot_dimension_numbers<[1], [0], [0], [1], [0, 0, 1, 1], [], []>} : vector<8x4xf32>, vector<4x288xf32>, vector<8x288xf32> -> vector<8x288xf32>
    %18 = arith.addf %12, %17 : vector<8x288xf32>
    %c0_18 = arith.constant 0 : index
    %c0_19 = arith.constant 0 : index
    %c18 = arith.constant 18 : index
    %19 = vector.load %arg1[%c0_18, %c0_19, %c18] : memref<1x4x326xf32, #tpu.memory_space<vmem>>, vector<1x4x288xf32>
    %20 = vector.shape_cast %19 : vector<1x4x288xf32> to vector<4x288xf32>
    %c3 = arith.constant 3 : index
    %c0_20 = arith.constant 0 : index
    %c0_21 = arith.constant 0 : index
    %21 = vector.load %arg2[%c3, %c0_20, %c0_21] : memref<9x8x4xf32, #tpu.memory_space<vmem>>, vector<1x8x4xf32>
    %22 = vector.shape_cast %21 : vector<1x8x4xf32> to vector<8x4xf32>
    %cst_22 = arith.constant dense<0.000000e+00> : vector<8x288xf32>
    %23 = tpu.matmul %22, %20, %cst_22 {dimension_numbers = #tpu.dot_dimension_numbers<[1], [0], [0], [1], [0, 0, 1, 1], [], []>} : vector<8x4xf32>, vector<4x288xf32>, vector<8x288xf32> -> vector<8x288xf32>
    %24 = arith.addf %18, %23 : vector<8x288xf32>
    %c0_23 = arith.constant 0 : index
    %c0_24 = arith.constant 0 : index
    %c19 = arith.constant 19 : index
    %25 = vector.load %arg1[%c0_23, %c0_24, %c19] : memref<1x4x326xf32, #tpu.memory_space<vmem>>, vector<1x4x288xf32>
    %26 = vector.shape_cast %25 : vector<1x4x288xf32> to vector<4x288xf32>
    %c4 = arith.constant 4 : index
    %c0_25 = arith.constant 0 : index
    %c0_26 = arith.constant 0 : index
    %27 = vector.load %arg2[%c4, %c0_25, %c0_26] : memref<9x8x4xf32, #tpu.memory_space<vmem>>, vector<1x8x4xf32>
    %28 = vector.shape_cast %27 : vector<1x8x4xf32> to vector<8x4xf32>
    %cst_27 = arith.constant dense<0.000000e+00> : vector<8x288xf32>
    %29 = tpu.matmul %28, %26, %cst_27 {dimension_numbers = #tpu.dot_dimension_numbers<[1], [0], [0], [1], [0, 0, 1, 1], [], []>} : vector<8x4xf32>, vector<4x288xf32>, vector<8x288xf32> -> vector<8x288xf32>
    %30 = arith.addf %24, %29 : vector<8x288xf32>
    %c0_28 = arith.constant 0 : index
    %c0_29 = arith.constant 0 : index
    %c20 = arith.constant 20 : index
    %31 = vector.load %arg1[%c0_28, %c0_29, %c20] : memref<1x4x326xf32, #tpu.memory_space<vmem>>, vector<1x4x288xf32>
    %32 = vector.shape_cast %31 : vector<1x4x288xf32> to vector<4x288xf32>
    %c5 = arith.constant 5 : index
    %c0_30 = arith.constant 0 : index
    %c0_31 = arith.constant 0 : index
    %33 = vector.load %arg2[%c5, %c0_30, %c0_31] : memref<9x8x4xf32, #tpu.memory_space<vmem>>, vector<1x8x4xf32>
    %34 = vector.shape_cast %33 : vector<1x8x4xf32> to vector<8x4xf32>
    %cst_32 = arith.constant dense<0.000000e+00> : vector<8x288xf32>
    %35 = tpu.matmul %34, %32, %cst_32 {dimension_numbers = #tpu.dot_dimension_numbers<[1], [0], [0], [1], [0, 0, 1, 1], [], []>} : vector<8x4xf32>, vector<4x288xf32>, vector<8x288xf32> -> vector<8x288xf32>
    %36 = arith.addf %30, %35 : vector<8x288xf32>
    %c0_33 = arith.constant 0 : index
    %c0_34 = arith.constant 0 : index
    %c36 = arith.constant 36 : index
    %37 = vector.load %arg1[%c0_33, %c0_34, %c36] : memref<1x4x326xf32, #tpu.memory_space<vmem>>, vector<1x4x288xf32>
    %38 = vector.shape_cast %37 : vector<1x4x288xf32> to vector<4x288xf32>
    %c6 = arith.constant 6 : index
    %c0_35 = arith.constant 0 : index
    %c0_36 = arith.constant 0 : index
    %39 = vector.load %arg2[%c6, %c0_35, %c0_36] : memref<9x8x4xf32, #tpu.memory_space<vmem>>, vector<1x8x4xf32>
    %40 = vector.shape_cast %39 : vector<1x8x4xf32> to vector<8x4xf32>
    %cst_37 = arith.constant dense<0.000000e+00> : vector<8x288xf32>
    %41 = tpu.matmul %40, %38, %cst_37 {dimension_numbers = #tpu.dot_dimension_numbers<[1], [0], [0], [1], [0, 0, 1, 1], [], []>} : vector<8x4xf32>, vector<4x288xf32>, vector<8x288xf32> -> vector<8x288xf32>
    %42 = arith.addf %36, %41 : vector<8x288xf32>
    %c0_38 = arith.constant 0 : index
    %c0_39 = arith.constant 0 : index
    %c37 = arith.constant 37 : index
    %43 = vector.load %arg1[%c0_38, %c0_39, %c37] : memref<1x4x326xf32, #tpu.memory_space<vmem>>, vector<1x4x288xf32>
    %44 = vector.shape_cast %43 : vector<1x4x288xf32> to vector<4x288xf32>
    %c7 = arith.constant 7 : index
    %c0_40 = arith.constant 0 : index
    %c0_41 = arith.constant 0 : index
    %45 = vector.load %arg2[%c7, %c0_40, %c0_41] : memref<9x8x4xf32, #tpu.memory_space<vmem>>, vector<1x8x4xf32>
    %46 = vector.shape_cast %45 : vector<1x8x4xf32> to vector<8x4xf32>
    %cst_42 = arith.constant dense<0.000000e+00> : vector<8x288xf32>
    %47 = tpu.matmul %46, %44, %cst_42 {dimension_numbers = #tpu.dot_dimension_numbers<[1], [0], [0], [1], [0, 0, 1, 1], [], []>} : vector<8x4xf32>, vector<4x288xf32>, vector<8x288xf32> -> vector<8x288xf32>
    %48 = arith.addf %42, %47 : vector<8x288xf32>
    %c0_43 = arith.constant 0 : index
    %c0_44 = arith.constant 0 : index
    %c38 = arith.constant 38 : index
    %49 = vector.load %arg1[%c0_43, %c0_44, %c38] : memref<1x4x326xf32, #tpu.memory_space<vmem>>, vector<1x4x288xf32>
    %50 = vector.shape_cast %49 : vector<1x4x288xf32> to vector<4x288xf32>
    %c8 = arith.constant 8 : index
    %c0_45 = arith.constant 0 : index
    %c0_46 = arith.constant 0 : index
    %51 = vector.load %arg2[%c8, %c0_45, %c0_46] : memref<9x8x4xf32, #tpu.memory_space<vmem>>, vector<1x8x4xf32>
    %52 = vector.shape_cast %51 : vector<1x8x4xf32> to vector<8x4xf32>
    %cst_47 = arith.constant dense<0.000000e+00> : vector<8x288xf32>
    %53 = tpu.matmul %52, %50, %cst_47 {dimension_numbers = #tpu.dot_dimension_numbers<[1], [0], [0], [1], [0, 0, 1, 1], [], []>} : vector<8x4xf32>, vector<4x288xf32>, vector<8x288xf32> -> vector<8x288xf32>
    %54 = arith.addf %48, %53 : vector<8x288xf32>
    %c0_48 = arith.constant 0 : index
    %c0_49 = arith.constant 0 : index
    %55 = vector.load %arg3[%c0_48, %c0_49] : memref<1x288xf32, #tpu.memory_space<vmem>>, vector<1x288xf32>
    %56 = vector.broadcast %55 : vector<1x288xf32> to vector<8x288xf32>
    %57 = arith.mulf %54, %56 : vector<8x288xf32>
    %cst_50 = arith.constant dense<0.000000e+00> : vector<8xf32>
    %58 = vector.multi_reduction <add>, %57, %cst_50 [1] : vector<8x288xf32> to vector<8xf32>
    %59 = vector.shape_cast %58 : vector<8xf32> to vector<8x1xf32>
    %60 = arith.mulf %57, %54 : vector<8x288xf32>
    %cst_51 = arith.constant dense<0.000000e+00> : vector<8xf32>
    %61 = vector.multi_reduction <add>, %60, %cst_51 [1] : vector<8x288xf32> to vector<8xf32>
    %62 = vector.shape_cast %61 : vector<8xf32> to vector<8x1xf32>
    %c0_i32 = arith.constant 0 : i32
    %63 = arith.cmpi eq, %arg0, %c0_i32 : i32
    %64 = arith.extui %63 : i1 to i32
    %c0_i32_52 = arith.constant 0 : i32
    %65 = arith.cmpi ne, %64, %c0_i32_52 : i32
    scf.if %65 {
      %cst_57 = arith.constant 0.000000e+00 : f32
      %70 = vector.broadcast %cst_57 : f32 to vector<8x2xf32>
      %c0_58 = arith.constant 0 : index
      %c0_59 = arith.constant 0 : index
      %71 = vector.load %arg4[%c0_58, %c0_59] : memref<8x2xf32, #tpu.memory_space<vmem>>, vector<8x2xf32>
      tpu.vector_store %arg4[%c0_58, %c0_59], %70 {strides = array<i32>} : memref<8x2xf32, #tpu.memory_space<vmem>>, vector<8x2xf32>,
    } else {
    }
    %c0_53 = arith.constant 0 : index
    %c0_54 = arith.constant 0 : index
    %66 = vector.load %arg4[%c0_53, %c0_54] : memref<8x2xf32, #tpu.memory_space<vmem>>, vector<8x2xf32>
    %67 = tpu.concatenate %59, %62 in 1 : vector<8x1xf32>, vector<8x1xf32> -> vector<8x2xf32>
    %68 = arith.addf %66, %67 : vector<8x2xf32>
    %c0_55 = arith.constant 0 : index
    %c0_56 = arith.constant 0 : index
    %69 = vector.load %arg4[%c0_55, %c0_56] : memref<8x2xf32, #tpu.memory_space<vmem>>, vector<8x2xf32>
    tpu.vector_store %arg4[%c0_55, %c0_56], %68 {strides = array<i32>} : memref<8x2xf32, #tpu.memory_space<vmem>>, vector<8x2xf32>,
    return
  }
  func.func @transform_0(%arg0: i32) -> (i32, i32, i32) {
    %c0_i32 = arith.constant 0 : i32
    %c0_i32_0 = arith.constant 0 : i32
    %c0_i32_1 = arith.constant 0 : i32
    return %arg0, %c0_i32, %c0_i32_0 : i32, i32, i32
  }
  func.func @transform_1(%arg0: i32) -> (i32, i32, i32) {
    %c0_i32 = arith.constant 0 : i32
    %c0_i32_0 = arith.constant 0 : i32
    %c0_i32_1 = arith.constant 0 : i32
    %c0_i32_2 = arith.constant 0 : i32
    return %c0_i32, %c0_i32_0, %c0_i32_1 : i32, i32, i32
  }
  func.func @transform_2(%arg0: i32) -> (i32, i32) {
    %c0_i32 = arith.constant 0 : i32
    %c0_i32_0 = arith.constant 0 : i32
    %c0_i32_1 = arith.constant 0 : i32
    return %c0_i32, %c0_i32_0 : i32, i32
  }
  func.func @transform_3(%arg0: i32) -> (i32, i32) {
    %c0_i32 = arith.constant 0 : i32
    %c0_i32_0 = arith.constant 0 : i32
    %c0_i32_1 = arith.constant 0 : i32
    return %c0_i32, %c0_i32_0 : i32, i32
  }
}

</mosaic_0001>

<bundles_post_ra>
// kernel: tpu_custom_call.1
= control target key start
LH: loop header
LB: loop body
LE: loop exit
PB: predicated region body
PF: predicated region fallthrough
CT: control target
= control target key end

     0   :  { %s1948_s12 = smov 0   ;;  %s2110_s0 = inlined_call_operand.vmem [shape: f32[2,4,326], index: 0, kind: input, shape index: {}]   ;;  %s2111_s1 = inlined_call_operand.vmem [shape: f32[9,8,4], index: 1, kind: input, shape index: {}]   ;;  %s2112_s2 = inlined_call_operand.vmem [shape: f32[1,288], index: 2, kind: input, shape index: {}]   ;;  %s2113_s3 = inlined_call_operand.vmem [shape: f32[8,2], index: 3, kind: output, shape index: {}]  }
   0x1 LB: > { %s1954_s13 = sadd.s32 4294967295, %s1915_s12   ;;  %p1735_p0 = scmp.ge.s32.totalorder %s1915_s12, 1  ;;  %s1915_s12 = sphi %s1948_s12, %s13_s12  }
   0x2   : > { %p132_p1 = scmp.lt.s32.totalorder %s1915_s12, 3 }
   0x4   : > { %p133_p2 = pnand %p1735_p0, %p132_p1 }
   0x5   : > { %p151_p3 = scmp.lt.s32.totalorder (!%p133_p2), %s1954_s13, 1  ;;  %v1917_v0 = vmov (!%p133_p2), 0.0   ;;  %vm1918_vm0 = vmmov (!%p133_p2), 0   ;;  %s1919_s19 = smov (!%p133_p2), 127   ;;  %vm177_vm1 = vcmask (!%p133_p2), 1043456   ;;  %vm170_vm2 = vcmask (!%p133_p2), 1039360  }
   0x6   : > { %136 = sbr.rel (%p133_p2) target bundleno = 575 (0x23f), region = 32  ;;  %1811 = vmatprep.subr.mxu1 (!%p133_p2), %v1917_v0  ;;  %1813 = vmatprep.mubr.msk.f32.mxu1 (!%p133_p2), %vm1918_vm0, %v1917_v0  ;;  %s1920_s20 = smov (!%p133_p2), 126   ;;  %v1737_v14 = vld [vmem:[%s2111_s1 + $0x8] sm:$0xff] (!%p133_p2)  ;;  %vm173_vm3 = vcmask (!%p133_p2), 31744   ;;  %vm488_vm4 = vcmask (!%p133_p2), 1031168   ;;  %v158_v21 = vld [vmem:[%s2111_s1] sm:$0xff] (!%p133_p2)  ;;  %v1660_v60 = vlaneseq (!%p133_p2) }
   0x7   : > { %248 = vmatprep.mubr.f32.mxu0 (!%p133_p2), %v1917_v0  ;;  %s1921_s21 = smov (!%p133_p2), 110   ;;  %s1922_s22 = smov (!%p133_p2), 109   ;;  %vm657_vm5 = vcmask (!%p133_p2), 900096   ;;  %v1748_v28 = vld [vmem:[%s2111_s1 + $0x10] sm:$0xff] (!%p133_p2)  ;;  %vm826_vm6 = vcmask (!%p133_p2), 891904   ;;  %v1754_v34 = vld [vmem:[%s2111_s1 + $0x18] sm:$0xff] (!%p133_p2) }
   0x8   : > { %s1923_s23 = smov (!%p133_p2), 108   ;;  %s1924_s24 = smov (!%p133_p2), 92   ;;  %vm995_vm7 = vcmask (!%p133_p2), 883712   ;;  %v1760_v40 = vld [vmem:[%s2111_s1 + $0x20] sm:$0xff] (!%p133_p2)  ;;  %vm1164_vm8 = vcmask (!%p133_p2), 752640   ;;  %v1766_v46 = vld [vmem:[%s2111_s1 + $0x28] sm:$0xff] (!%p133_p2) }
   0x9   : > { %s1925_s25 = smov (!%p133_p2), 91   ;;  %s1926_s26 = smov (!%p133_p2), 90   ;;  %vm1333_vm9 = vcmask (!%p133_p2), 744448   ;;  %v1772_v51 = vld [vmem:[%s2111_s1 + $0x30] sm:$0xff] (!%p133_p2)  ;;  %vm1502_vm10 = vcmask (!%p133_p2), 736256   ;;  %v1778_v57 = vld [vmem:[%s2111_s1 + $0x38] sm:$0xff] (!%p133_p2) }
   0xa   : > { %v1784_v59 = vld [vmem:[%s2111_s1 + $0x40] sm:$0xff] (!%p133_p2)  ;;  %v1661_v61 = vshrl.u32 (!%p133_p2), %v1660_v60, 7  ;;  %vm1679_vm11 = vcmask (!%p133_p2), 261120   ;;  %p1790_p4 = scmp.ne.s32.totalorder (!%p133_p2), %s1954_s13, 0 }
   0xb   : > { %v1658_v63 = vld [vmem:[%s2112_s2] sm:$0x7] (!%p133_p2) }
   0xc   : > { %v1670_v62 = vsub.s32 (!%p133_p2), 2, %v1661_v61 }
   0xd   : > { %s152_s14 = scalar_select %p151_p3, %s1954_s13, 1 }
   0xe   : > { %vm1696_vm12 = vcmask (!%p1790_p4), 15360  }
   0xf   : > { %s1888_s15 = smul.u32 12, %s152_s14 }
  0x11   : > { %s1967_s18 = scalar_lea.vmem %s2110_s0, %s1888_s15 }
  0x12   : > { %v156_v1 = vld [vmem:[%s1967_s18] sm:$0xff]  ;;  %v157_v3 = vld [vmem:[%s1967_s18 + $0x8] sm:$0xf] }
  0x13   : > { %164 = vrot.lane.b32.xlu1 %v156_v1, %s1919_s19  ;;  %v163_v2 = vcombine.high %v156_v1, %v156_v1  ;;  %v476_v4 = vld [vmem:[%s1967_s18 + $0x8] sm:$0xf] }
  0x14   : > { %v645_v5 = vld [vmem:[%s1967_s18 + $0x8] sm:$0xf] }
  0x15   : > { %166 = vrot.lane.b32.xlu0 %v163_v2, %s1919_s19  ;;  %v814_v6 = vld [vmem:[%s1967_s18 + $0x8] sm:$0xf] }
  0x16   : > { %v983_v7 = vld [vmem:[%s1967_s18 + $0x8] sm:$0xf] }
  0x17   : > { %484 = vrot.lane.b32.xlu1 %v163_v2, %s1920_s20  ;;  %v1152_v8 = vld [vmem:[%s1967_s18 + $0x8] sm:$0xf] }
  0x18   : > { %v1321_v9 = vld [vmem:[%s1967_s18 + $0x8] sm:$0xf] }
  0x19   : > { %168 = vrot.lane.b32.xlu0 %v157_v3, %s1919_s19  ;;  %v1490_v10 = vld [vmem:[%s1967_s18 + $0x8] sm:$0xf] }
  0x1b   : > { %482 = vrot.lane.b32.xlu1 %v156_v1, %s1920_s20 }
  0x1d   : > { %486 = vrot.lane.b32.xlu0 %v476_v4, %s1920_s20 }
  0x1f   : > { %655 = vrot.lane.b32.xlu1 %v645_v5, %s1921_s21 }
  0x21   : > { %653 = vrot.lane.b32.xlu0 %v163_v2, %s1921_s21 }
  0x23   : > { %822 = vrot.lane.b32.xlu1 %v163_v2, %s1922_s22 }
  0x25   : > { %651 = vrot.lane.b32.xlu0 %v156_v1, %s1921_s21 }
  0x27   : > { %820 = vrot.lane.b32.xlu1 %v156_v1, %s1922_s22 }
  0x29   : > { %824 = vrot.lane.b32.xlu0 %v814_v6, %s1922_s22 }
  0x2b   : > { %993 = vrot.lane.b32.xlu1 %v983_v7, %s1923_s23 }
  0x2d   : > { %991 = vrot.lane.b32.xlu0 %v163_v2, %s1923_s23 }
  0x2f   : > { %1160 = vrot.lane.b32.xlu1 %v163_v2, %s1924_s24 }
  0x31   : > { %989 = vrot.lane.b32.xlu0 %v156_v1, %s1923_s23 }
  0x33   : > { %1158 = vrot.lane.b32.xlu1 %v156_v1, %s1924_s24 }
  0x35   : > { %1162 = vrot.lane.b32.xlu0 %v1152_v8, %s1924_s24 }
  0x37   : > { %1331 = vrot.lane.b32.xlu1 %v1321_v9, %s1925_s25 }
  0x39   : > { %1329 = vrot.lane.b32.xlu0 %v163_v2, %s1925_s25 }
  0x3b   : > { %1498 = vrot.lane.b32.xlu1 %v163_v2, %s1926_s26 }
  0x3d   : > { %1327 = vrot.lane.b32.xlu0 %v156_v1, %s1925_s25 }
  0x3f   : > { %1496 = vrot.lane.b32.xlu1 %v156_v1, %s1926_s26 }
  0x41   : > { %1500 = vrot.lane.b32.xlu0 %v1490_v10, %s1926_s26 }
  0x85   : > { %v165_v11 = vpop.permute.xlu1 %164 }
  0x87   : > { %v167_v12 = vpop.permute.xlu0 %166 }
  0x88   : > { %v171_v17 = vsel %vm170_vm2, %v165_v11, %v167_v12 }
  0x89   : > { %v485_v13 = vpop.permute.xlu1 %484 }
  0x8b   : > { %v169_v15 = vpop.permute.xlu0 %168 }
  0x8c   : > { %1812 = vmatpush3.msk.msra.mxu1 %vm177_vm1, %v169_v15  ;;  %v172_v16 = vsel %vm170_vm2, %v167_v12, %v169_v15 }
  0x8d   : > { %1738 = vmatprep.subr.msk.mxu0 %vm177_vm1, %v172_v16  ;;  %1814 = vmatmul.mubr.msk.f32.vlgmr.msra.gmra.mrb[0].mxu1 %vm173_vm3, %v1737_v14  ;;  %v483_v18 = vpop.permute.xlu1 %482 }
  0x8e   : > { %1739 = vmatpush1.msk.msra.mxu0 %vm177_vm1, %v171_v17  ;;  %1816 = vmatprep.subr.mxu1 %v1917_v0  ;;  %v489_v24 = vsel %vm488_vm4, %v483_v18, %v485_v13 }
  0x8f   : > { %1740 = vmatmul.mubr.msk.f32.vlgmr.msra.gmra.mrb[0].mxu0 %vm173_vm3, %v1737_v14  ;;  %1743 = vmatprep.subr.msk.mxu0 %vm177_vm1, %v163_v2  ;;  %v487_v19 = vpop.permute.xlu0 %486  ;;  %v1666_v2 = vsub.s32 1, %v1661_v61 }
  0x90   : > { %1744 = vmatpush1.msk.msra.mxu0 %vm177_vm1, %v156_v1  ;;  %1817 = vmatpush3.msk.msra.mxu1 %vm177_vm1, %v157_v3  ;;  %v490_v20 = vsel %vm488_vm4, %v485_v13, %v487_v19  ;;  %v1662_v1 = vsub.s32 0, %v1661_v61  ;;  %v1671_v3 = vrot.slane %v1658_v63, %v1670_v62 }
  0x91   : > { %1818 = vmatprep.mubr.msk.f32.mxu1 %vm1918_vm0, %v1917_v0  ;;  %1749 = vmatprep.subr.msk.mxu0 %vm177_vm1, %v490_v20  ;;  %v656_v23 = vpop.permute.xlu1 %655  ;;  %v1667_v5 = vrot.slane %v1658_v63, %v1666_v2 }
  0x92   : > { %1821 = vmatprep.subr.mxu1 %v1917_v0  ;;  %398 = vmatprep.mubr.f32.mxu0 %v1917_v0  ;;  %v1663_v4 = vrot.slane %v1658_v63, %v1662_v1 }
  0x93   : > { %v654_v22 = vpop.permute.xlu0 %653 }
  0x94   : > { %v659_v25 = vsel %vm657_vm5, %v654_v22, %v656_v23 }
  0x95   : > { %1819 = vmatmul.mubr.msk.f32.vlgmr.msra.gmra.mrb[0].mxu1 %vm173_vm3, %v158_v21  ;;  %v823_v27 = vpop.permute.xlu1 %822 }
  0x96   : > { %1822 = vmatpush3.msk.msra.mxu1 %vm177_vm1, %v487_v19  ;;  %1823 = vmatprep.mubr.msk.f32.mxu1 %vm1918_vm0, %v1917_v0 }
  0x97   : > { %1745 = vmatmul.mubr.msk.f32.vlgmr.msra.gmra.mrb[0].mxu0 %vm173_vm3, %v158_v21  ;;  %v652_v26 = vpop.permute.xlu0 %651  ;;  %1826 = vmatprep.subr.mxu1 %v1917_v0 }
  0x98   : > { %1750 = vmatpush1.msk.msra.mxu0 %vm177_vm1, %v489_v24  ;;  %564 = vmatprep.mubr.f32.mxu0 %v1917_v0  ;;  %v658_v30 = vsel %vm657_vm5, %v652_v26, %v654_v22 }
  0x99   : > { %1755 = vmatprep.subr.msk.mxu0 %vm177_vm1, %v659_v25  ;;  %v821_v32 = vpop.permute.xlu1 %820 }
  0x9a   : > { %v827_v36 = vsel %vm826_vm6, %v821_v32, %v823_v27 }
  0x9b   : > { %v825_v29 = vpop.permute.xlu0 %824 }
  0x9c   : > { %v828_v31 = vsel %vm826_vm6, %v823_v27, %v825_v29 }
  0x9d   : > { %1824 = vmatmul.mubr.msk.f32.vlgmr.msra.gmra.mrb[0].mxu1 %vm173_vm3, %v1748_v28  ;;  %v994_v35 = vpop.permute.xlu1 %993 }
  0x9e   : > { %1827 = vmatpush3.msk.msra.mxu1 %vm177_vm1, %v656_v23  ;;  %1828 = vmatprep.mubr.msk.f32.mxu1 %vm1918_vm0, %v1917_v0  ;;  %v1927_v23 = vmov (!%p1790_p4), 0.0  }
  0x9f   : > { %1751 = vmatmul.mubr.msk.f32.vlgmr.msra.gmra.mrb[0].mxu0 %vm173_vm3, %v1748_v28  ;;  %1831 = vmatprep.subr.mxu1 %v1917_v0  ;;  %v992_v33 = vpop.permute.xlu0 %991  ;;  %1697 = vst.msk [vmem:[%s2113_s3] sm:$0xff] (!%p1790_p4), %vm1696_vm12, %v1927_v23 }
  0xa0   : > { %1756 = vmatpush1.msk.msra.mxu0 %vm177_vm1, %v658_v30  ;;  %733 = vmatprep.mubr.f32.mxu0 %v1917_v0  ;;  %v997_v37 = vsel %vm995_vm7, %v992_v33, %v994_v35 }
  0xa1   : > { %1761 = vmatprep.subr.msk.mxu0 %vm177_vm1, %v828_v31  ;;  %v1161_v39 = vpop.permute.xlu1 %1160 }
  0xa3   : > { %v990_v38 = vpop.permute.xlu0 %989 }
  0xa4   : > { %v996_v42 = vsel %vm995_vm7, %v990_v38, %v992_v33 }
  0xa5   : > { %1829 = vmatmul.mubr.msk.f32.vlgmr.msra.gmra.mrb[0].mxu1 %vm173_vm3, %v1754_v34  ;;  %v1159_v44 = vpop.permute.xlu1 %1158 }
  0xa6   : > { %1832 = vmatpush3.msk.msra.mxu1 %vm177_vm1, %v825_v29  ;;  %1833 = vmatprep.mubr.msk.f32.mxu1 %vm1918_vm0, %v1917_v0  ;;  %v1165_v48 = vsel %vm1164_vm8, %v1159_v44, %v1161_v39 }
  0xa7   : > { %1757 = vmatmul.mubr.msk.f32.vlgmr.msra.gmra.mrb[0].mxu0 %vm173_vm3, %v1754_v34  ;;  %1836 = vmatprep.subr.mxu1 %v1917_v0  ;;  %v1163_v41 = vpop.permute.xlu0 %1162 }
  0xa8   : > { %1762 = vmatpush1.msk.msra.mxu0 %vm177_vm1, %v827_v36  ;;  %902 = vmatprep.mubr.f32.mxu0 %v1917_v0  ;;  %v1166_v43 = vsel %vm1164_vm8, %v1161_v39, %v1163_v41 }
  0xa9   : > { %1767 = vmatprep.subr.msk.mxu0 %vm177_vm1, %v997_v37  ;;  %v1332_v47 = vpop.permute.xlu1 %1331 }
  0xab   : > { %v1330_v45 = vpop.permute.xlu0 %1329 }
  0xac   : > { %v1335_v49 = vsel %vm1333_vm9, %v1330_v45, %v1332_v47 }
  0xad   : > { %1834 = vmatmul.mubr.msk.f32.vlgmr.msra.gmra.mrb[0].mxu1 %vm173_vm3, %v1760_v40  ;;  %v1499_v53 = vpop.permute.xlu1 %1498 }
  0xae   : > { %1837 = vmatpush3.msk.msra.mxu1 %vm177_vm1, %v994_v35  ;;  %1838 = vmatprep.mubr.msk.f32.mxu1 %vm1918_vm0, %v1917_v0 }
  0xaf   : > { %1763 = vmatmul.mubr.msk.f32.vlgmr.msra.gmra.mrb[0].mxu0 %vm173_vm3, %v1760_v40  ;;  %1841 = vmatprep.subr.mxu1 %v1917_v0  ;;  %v1328_v50 = vpop.permute.xlu0 %1327 }
  0xb0   : > { %1768 = vmatpush1.msk.msra.mxu0 %vm177_vm1, %v996_v42  ;;  %1071 = vmatprep.mubr.f32.mxu0 %v1917_v0  ;;  %v1334_v54 = vsel %vm1333_vm9, %v1328_v50, %v1330_v45 }
  0xb1   : > { %1773 = vmatprep.subr.msk.mxu0 %vm177_vm1, %v1166_v43  ;;  %v1497_v56 = vpop.permute.xlu1 %1496 }
  0xb2   : > { %v1503_v58 = vsel %vm1502_vm10, %v1497_v56, %v1499_v53 }
  0xb3   : > { %v1501_v52 = vpop.permute.xlu0 %1500 }
  0xb4   : > { %v1504_v55 = vsel %vm1502_vm10, %v1499_v53, %v1501_v52 }
  0xb5   : > { %1839 = vmatmul.mubr.msk.f32.vlgmr.msra.gmra.mrb[0].mxu1 %vm173_vm3, %v1766_v46 }
  0xb6   : > { %1842 = vmatpush3.msk.msra.mxu1 %vm177_vm1, %v1163_v41  ;;  %1843 = vmatprep.mubr.msk.f32.mxu1 %vm1918_vm0, %v1917_v0 }
  0xb7   : > { %1769 = vmatmul.mubr.msk.f32.vlgmr.msra.gmra.mrb[0].mxu0 %vm173_vm3, %v1766_v46  ;;  %1846 = vmatprep.subr.mxu1 %v1917_v0 }
  0xb8   : > { %1774 = vmatpush1.msk.msra.mxu0 %vm177_vm1, %v1165_v48  ;;  %1240 = vmatprep.mubr.f32.mxu0 %v1917_v0 }
  0xb9   : > { %1779 = vmatprep.subr.msk.mxu0 %vm177_vm1, %v1335_v49 }
  0xbd   : > { %1844 = vmatmul.mubr.msk.f32.vlgmr.msra.gmra.mrb[0].mxu1 %vm173_vm3, %v1772_v51 }
  0xbe   : > { %1847 = vmatpush3.msk.msra.mxu1 %vm177_vm1, %v1332_v47  ;;  %1848 = vmatprep.mubr.msk.f32.mxu1 %vm1918_vm0, %v1917_v0 }
  0xbf   : > { %1775 = vmatmul.mubr.msk.f32.vlgmr.msra.gmra.mrb[0].mxu0 %vm173_vm3, %v1772_v51  ;;  %1851 = vmatprep.subr.mxu1 %v1917_v0 }
  0xc0   : > { %1780 = vmatpush1.msk.msra.mxu0 %vm177_vm1, %v1334_v54  ;;  %1409 = vmatprep.mubr.f32.mxu0 %v1917_v0 }
  0xc1   : > { %1785 = vmatprep.subr.msk.mxu0 %vm177_vm1, %v1504_v55 }
  0xc5   : > { %1849 = vmatmul.mubr.msk.f32.vlgmr.msra.gmra.mrb[0].mxu1 %vm173_vm3, %v1778_v57 }
  0xc6   : > { %1852 = vmatpush3.msk.msra.mxu1 %vm177_vm1, %v1501_v52  ;;  %1853 = vmatprep.mubr.msk.f32.mxu1 %vm1918_vm0, %v1917_v0 }
  0xc7   : > { %1781 = vmatmul.mubr.msk.f32.vlgmr.msra.gmra.mrb[0].mxu0 %vm173_vm3, %v1778_v57 }
  0xc8   : > { %1786 = vmatpush1.msk.msra.mxu0 %vm177_vm1, %v1503_v58  ;;  %1578 = vmatprep.mubr.f32.mxu0 %v1917_v0 }
  0xcd   : > { %1854 = vmatmul.mubr.msk.f32.vlgmr.msra.gmra.mrb[0].mxu1 %vm173_vm3, %v1784_v59 }
  0xcf   : > { %1787 = vmatmul.mubr.msk.f32.vlgmr.msra.gmra.mrb[0].mxu0 %vm173_vm3, %v1784_v59 }
 0x1a0   : > { %v1651_v0 = vpop.f32.mrb[0].mxu1 }
 0x1a1   : > { %v1677_v6 = vmul.f32 %v1671_v3, %v1651_v0  ;;  %v1855_v7 = vpop.f32.mrb[1].mxu1 }
 0x1a2   : > { %v1580_v8 = vpop.f32.mrb[0].mxu0 }
 0x1a3   : > { %v1675_v9 = vmul.f32 %v1663_v4, %v1580_v8  ;;  %v1582_v10 = vpop.f32.mrb[1].mxu0  ;;  %v1686_v12 = vmul.f32 %v1677_v6, %v1651_v0  ;;  %v1680_v16 = vsel %vm1679_vm11, %v1677_v6, 0.0 }
 0x1a4   : > { %v1676_v11 = vmul.f32 %v1667_v5, %v1582_v10 }
 0x1a5   : > { %v1684_v13 = vmul.f32 %v1675_v9, %v1580_v8  ;;  %v1688_v19 = vsel %vm1679_vm11, %v1686_v12, 0.0 }
 0x1a6   : > { %v1678_v14 = vadd.f32 %v1676_v11, %v1675_v9  ;;  %v1685_v15 = vmul.f32 %v1676_v11, %v1582_v10 }
 0x1a8   : > { %v1687_v17 = vadd.f32 %v1685_v15, %v1684_v13  ;;  %v1681_v18 = vadd.f32 %v1680_v16, %v1678_v14 }
 0x1aa   : > { %1682 = vadd.xlane.f32.xlu0 %v1681_v18  ;;  %v1689_v20 = vadd.f32 %v1688_v19, %v1687_v17 }
 0x1ac   : > { %1690 = vadd.xlane.f32.xlu1 %v1689_v20 }
 0x233   : > { %1695 = sbr.rel (%p1790_p4) target bundleno = 570 (0x23a), region = 36 }
 0x237   : > { %v1683_v21 = vpop.xlane.xlu0 %1682 }
 0x239   : > { %v1691_v22 = vpop.xlane.xlu1 %1690 }
 0x23a PF: > { %v1698_v24 = vld [vmem:[%s2113_s3] sm:$0xff]  ;;  %vm1699_vm13 = vcmask 7168   ;;  %vm1702_vm14 = vcmask 15360  }
 0x23b   : > { %v1700_v25 = vsel %vm1699_vm13, %v1683_v21, %v1691_v22 }
 0x23c   : > { %v1701_v26 = vadd.f32 %v1700_v25, %v1698_v24 }
 0x23e   : > { %1703 = vst.msk [vmem:[%s2113_s3] sm:$0xff] %vm1702_vm14, %v1701_v26 }
 0x23f PF: > { %s13_s12 = sadd.s32 1, %s1915_s12  }
 0x240   : > { %p10_p5 = scmp.ge.s32.totalorder %s13_s12, 4  }
 0x242   :  { %12 = sbr.rel (!%p10_p5) target bundleno = 1 (0x1), region = 70 }

</bundles_post_ra>
